<compile_context>
chip_gen: v7x
topology: tpu7x:2x2x1
jax: 0.10.0
libtpu: 0.0.40
codegen_flags: <defaults>
</compile_context>

<pallas_src>
import numpy as np
import jax
import jax.numpy as jnp
from jax.experimental import pallas as pl
from jax.experimental.pallas import tpu as pltpu


def _cdb_ce_kernel(logits_ref, target_ref, wsamp_ref, out_ref):
    """One batch tile: logits (TN, C), target (TN, 1) int32, wsamp (TN, 1) f32."""
    logits = logits_ref[...].astype(jnp.float32)              # (TN, C), f32 math
    target = target_ref[...]                                   # (TN, 1) int32
    w = wsamp_ref[...]                                          # (TN, 1) f32 = weights[target]

    tn, c = logits.shape

    # Numerically-stable log-sum-exp over the class (lane) axis.
    m = jnp.max(logits, axis=-1, keepdims=True)                 # (TN, 1)   XLU
    p = jnp.exp(logits - m)                                      # (TN, C)   EUP
    lse = jnp.log(jnp.sum(p, axis=-1, keepdims=True)) + m       # (TN, 1)   XLU + EUP

    # One-hot gather of the target logit along the lane axis.
    cls_ids = jax.lax.broadcasted_iota(jnp.int32, (tn, c), dimension=1)
    onehot = (cls_ids == target).astype(jnp.float32)
    tgt_logit = jnp.sum(onehot * logits, axis=-1, keepdims=True)  # (TN, 1)  XLU

    # Weighted negative log-likelihood, reduction='none'.
    out_ref[...] = w * (lse - tgt_logit)


def _round_up(x, m):
    return (x + m - 1) // m * m


def _pick_batch_tile(n, c, itemsize, vmem_budget_bytes=4 * 1024 * 1024, cap=1024):
    """Largest multiple-of-8 row tile whose logits block fits a single-buffer
    VMEM budget (Pallas double-buffers, so real footprint ~2x this)."""
    rows_by_vmem = max(8, (vmem_budget_bytes // max(1, c * itemsize)) // 8 * 8)
    tn = min(int(cap), int(rows_by_vmem), _round_up(n, 8))
    return max(8, (tn // 8) * 8)


def cdb_loss_forward(logits, target, class_weights, *, max_tile_rows=1024):
    """logits: (N, C) float32/bfloat16; target: (N,) int; class_weights: (C,) float32.

    Returns per-sample weighted cross-entropy loss, shape (N,), float32
    (matches nn.CrossEntropyLoss(weight=w, reduction='none')).
    """
    n, c = logits.shape
    target_2d = target.astype(jnp.int32).reshape(n, 1)
    # Hoisted per-sample weight gather: plain XLA gather over an (N,) vector.
    w_sample = class_weights.astype(jnp.float32)[target_2d[:, 0]].reshape(n, 1)

    itemsize = np.dtype(logits.dtype).itemsize
    tn = _pick_batch_tile(n, c, itemsize, cap=max_tile_rows)
    grid = (pl.cdiv(n, tn),)

    # Advisory cost estimate (mem-bound kernel: logits read dominates).
    bytes_accessed = n * c * itemsize + n * (4 + 4 + 4)
    cost = pl.CostEstimate(
        flops=5 * n * c,                 # sub, cmp, mul, add, reductions (order-of-magnitude)
        transcendentals=n * c + n,       # exp per element + log per row
        bytes_accessed=bytes_accessed,
    )

    out = pl.pallas_call(
        _cdb_ce_kernel,
        out_shape=jax.ShapeDtypeStruct((n, 1), jnp.float32),
        grid=grid,
        in_specs=[
            pl.BlockSpec((tn, c), lambda i: (i, 0)),
            pl.BlockSpec((tn, 1), lambda i: (i, 0)),
            pl.BlockSpec((tn, 1), lambda i: (i, 0)),
        ],
        out_specs=pl.BlockSpec((tn, 1), lambda i: (i, 0)),
        compiler_params=pltpu.CompilerParams(
            dimension_semantics=("parallel",),
            vmem_limit_bytes=32 * 1024 * 1024,
        ),
        cost_estimate=cost,
    )(logits, target_2d, w_sample)
    return out[:, 0]


def make_cdb_weights(class_difficulty, tau="dynamic"):
    """Replicates CDB_loss.__init__ weight construction (host-side numpy glue)."""
    cd = np.asarray(class_difficulty, dtype=np.float32)
    if tau == "dynamic":
        bias = (1.0 - np.min(cd)) / (1.0 - np.max(cd) + 0.01)
        tau = 1.0 / (1.0 + np.exp(-bias))  # sigmoid
    else:
        tau = float(tau)
    w = cd ** tau
    w = w / w.sum() * len(w)
    return jnp.asarray(w, dtype=jnp.float32)


def _ref_loss(logits, target, class_weights):
    lg = logits.astype(jnp.float32)
    lse = jax.nn.logsumexp(lg, axis=-1)
    tgt_logit = jnp.take_along_axis(lg, target[:, None], axis=-1)[:, 0]
    return class_weights[target] * (lse - tgt_logit)


if __name__ == "__main__":
    key = jax.random.PRNGKey(0)
    k_logit, k_tgt, k_diff, k_logit2, k_tgt2 = jax.random.split(key, 5)

    N, C = 8, 32  # small: batch of 8 samples, 32 classes

    # Deterministic synthetic class difficulties in (0, 1).
    class_difficulty = jax.random.uniform(k_diff, (C,), minval=0.05, maxval=0.95)
    class_weights = make_cdb_weights(np.asarray(class_difficulty), tau="dynamic")

    # --- case 1: f32 logits, single tile ---
    logits = jax.random.normal(k_logit, (N, C), dtype=jnp.float32)
    target = jax.random.randint(k_tgt, (N,), 0, C, dtype=jnp.int32)

    loss = jax.block_until_ready(cdb_loss_forward(logits, target, class_weights))
    ref = _ref_loss(logits, target, class_weights)
    np.testing.assert_allclose(np.asarray(loss), np.asarray(ref), rtol=1e-5, atol=1e-5)

    # --- case 2: bf16 logits, forced multi-tile grid with a partial last block ---
    N2 = 20
    logits2 = jax.random.normal(k_logit2, (N2, C)).astype(jnp.bfloat16)
    target2 = jax.random.randint(k_tgt2, (N2,), 0, C, dtype=jnp.int32)

    loss2 = jax.block_until_ready(
        cdb_loss_forward(logits2, target2, class_weights, max_tile_rows=8))
    ref2 = _ref_loss(logits2, target2, class_weights)
    np.testing.assert_allclose(np.asarray(loss2), np.asarray(ref2), rtol=1e-4, atol=1e-4)

    print("KERNEL_OK")
</pallas_src>

<mosaic_0001>
module attributes {stable_mosaic.version = 11 : i64} {
  func.func @_cdb_ce_kernel(%arg0: i32, %arg1: memref<8x32xf32, #tpu.memory_space<vmem>>, %arg2: memref<8x1xi32, #tpu.memory_space<vmem>>, %arg3: memref<8x1xf32, #tpu.memory_space<vmem>>, %arg4: memref<8x1xf32, #tpu.memory_space<vmem>>) attributes {dimension_semantics = [#tpu.dimension_semantics<parallel>], iteration_bounds = array<i64: 1>, scalar_prefetch = 0 : i64, scratch_operands = 0 : i64, tpu.core_type = #tpu.core_type<tc>, window_params = [{transform_indices = @transform_0, window_bounds = array<i64: 8, 32>}, {transform_indices = @transform_1, window_bounds = array<i64: 8, 1>}, {transform_indices = @transform_2, window_bounds = array<i64: 8, 1>}, {transform_indices = @transform_3, window_bounds = array<i64: 8, 1>}]} {
    %c0 = arith.constant 0 : index
    %c0_0 = arith.constant 0 : index
    %0 = vector.load %arg1[%c0, %c0_0] : memref<8x32xf32, #tpu.memory_space<vmem>>, vector<8x32xf32>
    %c0_1 = arith.constant 0 : index
    %c0_2 = arith.constant 0 : index
    %1 = vector.load %arg2[%c0_1, %c0_2] : memref<8x1xi32, #tpu.memory_space<vmem>>, vector<8x1xi32>
    %c0_3 = arith.constant 0 : index
    %c0_4 = arith.constant 0 : index
    %2 = vector.load %arg3[%c0_3, %c0_4] : memref<8x1xf32, #tpu.memory_space<vmem>>, vector<8x1xf32>
    %cst = arith.constant dense<0xFF800000> : vector<8xf32>
    %3 = vector.multi_reduction <maximumf>, %0, %cst [1] : vector<8x32xf32> to vector<8xf32>
    %4 = vector.shape_cast %3 : vector<8xf32> to vector<8x1xf32>
    %5 = vector.broadcast %4 : vector<8x1xf32> to vector<8x32xf32>
    %6 = arith.subf %0, %5 : vector<8x32xf32>
    %7 = math.exp %6 : vector<8x32xf32>
    %cst_5 = arith.constant dense<0.000000e+00> : vector<8xf32>
    %8 = vector.multi_reduction <add>, %7, %cst_5 [1] : vector<8x32xf32> to vector<8xf32>
    %9 = vector.shape_cast %8 : vector<8xf32> to vector<8x1xf32>
    %10 = math.log %9 : vector<8x1xf32>
    %11 = arith.addf %10, %4 : vector<8x1xf32>
    %12 = tpu.iota {dimensions = array<i32: 1>} : vector<8x32xi32>
    %13 = vector.broadcast %1 : vector<8x1xi32> to vector<8x32xi32>
    %14 = arith.cmpi eq, %12, %13 : vector<8x32xi32>
    %15 = arith.extui %14 : vector<8x32xi1> to vector<8x32xi32>
    %16 = arith.sitofp %15 : vector<8x32xi32> to vector<8x32xf32>
    %17 = arith.mulf %16, %0 : vector<8x32xf32>
    %cst_6 = arith.constant dense<0.000000e+00> : vector<8xf32>
    %18 = vector.multi_reduction <add>, %17, %cst_6 [1] : vector<8x32xf32> to vector<8xf32>
    %19 = vector.shape_cast %18 : vector<8xf32> to vector<8x1xf32>
    %20 = arith.subf %11, %19 : vector<8x1xf32>
    %21 = arith.mulf %2, %20 : vector<8x1xf32>
    %c0_7 = arith.constant 0 : index
    %c0_8 = arith.constant 0 : index
    %22 = vector.load %arg4[%c0_7, %c0_8] : memref<8x1xf32, #tpu.memory_space<vmem>>, vector<8x1xf32>
    tpu.vector_store %arg4[%c0_7, %c0_8], %21 {strides = array<i32>} : memref<8x1xf32, #tpu.memory_space<vmem>>, vector<8x1xf32>,
    return
  }
  func.func @transform_0(%arg0: i32) -> (i32, i32) {
    %c0_i32 = arith.constant 0 : i32
    %c0_i32_0 = arith.constant 0 : i32
    return %arg0, %c0_i32 : i32, i32
  }
  func.func @transform_1(%arg0: i32) -> (i32, i32) {
    %c0_i32 = arith.constant 0 : i32
    %c0_i32_0 = arith.constant 0 : i32
    return %arg0, %c0_i32 : i32, i32
  }
  func.func @transform_2(%arg0: i32) -> (i32, i32) {
    %c0_i32 = arith.constant 0 : i32
    %c0_i32_0 = arith.constant 0 : i32
    return %arg0, %c0_i32 : i32, i32
  }
  func.func @transform_3(%arg0: i32) -> (i32, i32) {
    %c0_i32 = arith.constant 0 : i32
    %c0_i32_0 = arith.constant 0 : i32
    return %arg0, %c0_i32 : i32, i32
  }
}

</mosaic_0001>

<bundles_post_ra>
// kernel: tpu_custom_call.1
= control target key start
LH: loop header
LB: loop body
LE: loop exit
PB: predicated region body
PF: predicated region fallthrough
CT: control target
= control target key end

     0   :  { %vm17_vm0 = vcmask 261120   ;;  %v58_v1 = vmov 0   ;;  %v30_v6 = vlaneseq  ;;  %v59_v10 = vmov 0.0   ;;  %s95_s0 = inlined_call_operand.vmem [shape: f32[8,32], index: 0, kind: input, shape index: {}]   ;;  %s96_s1 = inlined_call_operand.vmem [shape: s32[8,1], index: 1, kind: input, shape index: {}]   ;;  %s97_s2 = inlined_call_operand.vmem [shape: f32[8,1], index: 2, kind: input, shape index: {}]   ;;  %s98_s3 = inlined_call_operand.vmem [shape: f32[8,1], index: 3, kind: output, shape index: {}]  }
   0x1   :  { %v14_v0 = vld [vmem:[%s95_s0] sm:$0xff]  ;;  %53 = vset.pattern.permute.xlu0 %v58_v1  ;;  %vm44_vm2 = vcmask 7168  }
   0x2   :  { %v18_v2 = vsel %vm17_vm0, %v14_v0, -inf  ;;  %v15_v3 = vld [vmem:[%s96_s1] sm:$0xff]  ;;  %v31_v8 = vand.u32 127, %v30_v6 }
   0x3   :  { %19 = vmax.xlane.f32.xlu0 %v18_v2  ;;  %v16_v21 = vld [vmem:[%s97_s2] sm:$0xff] }
  0x19   :  { %33 = vperm.xlu0 %53, %v15_v3  }
  0x90   :  { %v20_v4 = vpop.xlane.xlu0 %19 }
  0x91   :  { %v21_v5 = vsub.f32 %v14_v0, %v20_v4 }
  0x93   :  { %v22_v7 = vmul.f32 1.442695, %v21_v5 }
  0x95   :  { %54 = vpow2.f32 %v22_v7 }
  0x98   :  { %v34_v9 = vpop.permute.xlu0 %33 }
  0x99   :  { %vm35_vm1 = vcmp.eq.s32.totalorder %v31_v8, %v34_v9 }
  0x9a   :  { %v50_v11 = vsel %vm35_vm1, 1.0, %v59_v10 }
  0x9b   :  { %v38_v12 = vmul.f32 %v50_v11, %v14_v0 }
  0x9d   :  { %v39_v15 = vsel %vm17_vm0, %v38_v12, 0.0 }
  0x9f   :  { %v55_v13 = vpop.eup %54 }
  0xa0   :  { %v24_v14 = vsel %vm17_vm0, %v55_v13, 0.0 }
  0xa1   :  { %25 = vadd.xlane.f32.xlu1 %v24_v14 }
  0xa5   :  { %40 = vadd.xlane.f32.xlu1 %v39_v15 }
 0x12e   :  { %v26_v16 = vpop.xlane.xlu1 %25 }
 0x12f   :  { %56 = vlog2.f32 %v26_v16 }
 0x132   :  { %v41_v19 = vpop.xlane.xlu1 %40 }
 0x139   :  { %v57_v17 = vpop.eup %56 }
 0x13a   :  { %v28_v18 = vmul.f32 0.6931472, %v57_v17 }
 0x13c   :  { %v29_v20 = vadd.f32 %v28_v18, %v20_v4 }
 0x13e   :  { %v42_v22 = vsub.f32 %v29_v20, %v41_v19 }
 0x140   :  { %v43_v23 = vmul.f32 %v42_v22, %v16_v21 }
 0x142   :  { %45 = vst.msk [vmem:[%s98_s3] sm:$0xff] %vm44_vm2, %v43_v23 }

</bundles_post_ra>
